<compile_context>
chip_gen: v7x
topology: tpu7x:2x2x1
jax: 0.10.0
libtpu: 0.0.40
codegen_flags: <defaults>
</compile_context>

<pallas_src>
import functools

import jax
import jax.numpy as jnp
from jax.experimental import pallas as pl
from jax.experimental.pallas import tpu as pltpu
from jax.scipy import linalg as jsp_linalg


def _mvg_kernel(x_ref, mean_ref, cov_ref, *, batch_size, num_features):
    """Per-tile mean + unbiased covariance, lane-parallel over locations.

    x_ref    : (B*C, TN)  VMEM  - batch-packed observations for TN locations
    mean_ref : (C,   TN)  VMEM  - per-location mean over the batch
    cov_ref  : (C*C, TN)  VMEM  - per-location covariance, flat row-major (c, d)
    """
    B, C = batch_size, num_features
    x = x_ref[...].astype(jnp.float32)                       # (B*C, TN)

    # Per-batch (C, TN) views via static slices of the packed sublane axis.
    xb = [x[b * C:(b + 1) * C, :] for b in range(B)]

    # Mean over the batch: pure lane-dense VPU adds.
    mu = xb[0]
    for b in range(1, B):
        mu = mu + xb[b]
    mu = mu * jnp.float32(1.0 / B)                            # (C, TN)
    mean_ref[...] = mu.astype(mean_ref.dtype)

    xm = [v - mu for v in xb]                                 # B x (C, TN)
    inv_bm1 = jnp.float32(1.0 / (B - 1))

    # Lane-parallel covariance:
    #   cov[c*C + d, n] = sum_b xm[b,c,n] * xm[b,d,n] / (B-1)
    # Pure VPU work over the lane-dense TN axis; no MXU, no transposes.
    # Ridge is added on the XLA side (fused with the transpose), not here.
    for c in range(C):
        acc = xm[0][c:c + 1, :] * xm[0]                       # (C, TN)
        for b in range(1, B):
            acc = acc + xm[b][c:c + 1, :] * xm[b]
        cov_ref[c * C:(c + 1) * C, :] = acc * inv_bm1


def _device_kind() -> str:
    try:
        return jax.devices()[0].device_kind.lower()
    except Exception:  # pragma: no cover - defensive
        return ""


def _vmem_limit_bytes(kind: str) -> int:
    """Per-generation scoped-VMEM limit (headroom below physical per TC)."""
    if "v5" in kind or "v6" in kind:
        return 96 * 1024 * 1024        # 128 MiB physical per TensorCore
    if "v7" in kind or "7x" in kind:
        return 48 * 1024 * 1024        # v7x: only 64 MiB per TensorCore
    return 32 * 1024 * 1024            # unknown / older generations: conservative


def _round_up(x: int, m: int) -> int:
    return ((x + m - 1) // m) * m


def _choose_tile_n(n: int, b: int, c: int, in_itemsize: int,
                   vmem_limit_bytes: int, kind: str) -> int:
    """Largest lane-aligned (128-multiple) spatial tile fitting the VMEM budget."""
    if n <= 128:
        return n
    n_cap = _round_up(n, 128)
    # Per-location VMEM bytes:
    #   double-buffered pipeline blocks: input (B*C rows) + mean (C) + cov (C*C)
    #   plus single-buffered in-kernel intermediates (x_f32, xm, cov rows).
    blocks = 2 * (b * c * in_itemsize + 4 * (c + c * c))
    interm = 4 * (2 * b * c + 2 * c * c)
    per_loc = blocks + interm
    budget = max(vmem_limit_bytes - (4 << 20), vmem_limit_bytes // 2)
    cap = max(128, (budget // per_loc) // 128 * 128)

    if "v7" in kind or "7x" in kind:
        # Two TensorCores share the ("parallel",) grid axis: target an even
        # number of grid steps (ideally exactly 2 big blocks).
        tile = min(cap, _round_up(-(-n // 2), 128), n_cap)
        steps = -(-n // tile)
        if steps > 1 and steps % 2 == 1:
            tile = max(128, min(cap, _round_up(-(-n // (steps + 1)), 128)))
        return int(tile)

    # v5e / v6e: single TensorCore, so no multi-step constraint -- take the
    # biggest tile that fits (fewer grid steps, longer lane-dense DMAs); the
    # soft cap bounds live-value pressure of the unrolled covariance loop.
    return int(min(cap, 16384, n_cap))


def multivariate_gaussian_fit(embedding: jax.Array, *, tile_n: int | None = None):
    """Pallas implementation of MultiVariateGaussian.forward.

    Args:
        embedding: (B, C, N) array (any float dtype; compute is f32).
        tile_n: spatial locations per grid step (default: auto from VMEM budget).

    Returns:
        [mean (C, N), inv_covariance (N, C, C)]
    """
    B, C, N = embedding.shape
    if B < 2:
        raise ValueError(
            "MultiVariateGaussian requires batch_size >= 2 (unbiased covariance "
            "divides by B - 1)."
        )

    kind = _device_kind()
    vmem_limit = _vmem_limit_bytes(kind)
    if tile_n is None:
        tile_n = _choose_tile_n(N, B, C, embedding.dtype.itemsize, vmem_limit, kind)

    # Layout-free merge of the leading dims; no dtype cast, no padding pass.
    x2d = embedding.reshape(B * C, N)

    kernel = functools.partial(_mvg_kernel, batch_size=B, num_features=C)

    mean, cov_flat = pl.pallas_call(
        kernel,
        out_shape=(
            jax.ShapeDtypeStruct((C, N), embedding.dtype),
            jax.ShapeDtypeStruct((C * C, N), jnp.float32),
        ),
        grid_spec=pltpu.PrefetchScalarGridSpec(
            num_scalar_prefetch=0,
            grid=(pl.cdiv(N, tile_n),),          # ragged last block handled by Pallas
            in_specs=[
                pl.BlockSpec((B * C, tile_n), lambda i: (0, i)),
            ],
            out_specs=[
                pl.BlockSpec((C, tile_n), lambda i: (0, i)),
                pl.BlockSpec((C * C, tile_n), lambda i: (0, i)),
            ],
        ),
        compiler_params=pltpu.CompilerParams(
            dimension_semantics=("parallel",),
            vmem_limit_bytes=vmem_limit,
        ),
    )(x2d)

    reg = jnp.float32(0.01 + 1e-5)
    eye = jnp.eye(C, dtype=jnp.float32)

    # (C*C, N) -> (C, C, N) -> (N, C, C); the diagonal ridge add fuses into the
    # same XLA pass as the transpose.
    cov_ncc = jnp.transpose(cov_flat.reshape(C, C, N), (2, 0, 1)) + reg * eye

    # SPD inverse via batched Cholesky (cov + ridge is SPD by construction):
    # ~2x fewer flops and better conditioned than a general LU inverse.
    chol = jnp.linalg.cholesky(cov_ncc)
    inv_covariance = jsp_linalg.cho_solve(
        (chol, True), jnp.broadcast_to(eye, cov_ncc.shape)
    )

    return [mean, inv_covariance]


def _reference(embedding: jax.Array):
    """Pure-JAX reference mirroring the PyTorch code, for sanity checking."""
    B, C, N = embedding.shape
    mean = jnp.mean(embedding, axis=0)                     # (C, N)
    x = jnp.transpose(embedding, (2, 0, 1))                # (N, B, C)
    mu = jnp.mean(x, axis=1, keepdims=True)                # (N, 1, C)
    xm = x - mu
    cov = jnp.einsum("nbc,nbd->ncd", xm, xm) / (B - 1)
    eye = jnp.eye(C, dtype=embedding.dtype)
    cov = cov + 0.01 * eye[None] + 1e-5 * eye[None]
    return [mean, jnp.linalg.inv(cov)]


if __name__ == "__main__":
    key = jax.random.PRNGKey(0)
    B, C, H, W = 2, 4, 16, 16
    N = H * W
    embedding = jax.random.normal(key, (B, C, N), dtype=jnp.float32)

    fit = jax.jit(multivariate_gaussian_fit)
    mean, inv_cov = fit(embedding)
    mean = jax.block_until_ready(mean)
    inv_cov = jax.block_until_ready(inv_cov)

    # Sanity check against pure-JAX reference (reference uses LU-based inv,
    # kernel path uses Cholesky -> compare with a slightly looser tolerance).
    ref_mean, ref_inv_cov = _reference(embedding)
    assert mean.shape == (C, N)
    assert inv_cov.shape == (N, C, C)
    assert jnp.allclose(mean, ref_mean, atol=1e-5, rtol=1e-5)
    assert jnp.allclose(inv_cov, ref_inv_cov, atol=1e-2, rtol=1e-2)

    print("KERNEL_OK")
</pallas_src>

<mosaic_0001>
module attributes {stable_mosaic.version = 11 : i64} {
  func.func @_mvg_kernel(%arg0: i32, %arg1: memref<8x256xf32, #tpu.memory_space<vmem>>, %arg2: memref<4x256xf32, #tpu.memory_space<vmem>>, %arg3: memref<16x256xf32, #tpu.memory_space<vmem>>) attributes {dimension_semantics = [#tpu.dimension_semantics<parallel>], iteration_bounds = array<i64: 1>, scalar_prefetch = 0 : i64, scratch_operands = 0 : i64, tpu.core_type = #tpu.core_type<tc>, window_params = [{transform_indices = @transform_0, window_bounds = array<i64: 8, 256>}, {transform_indices = @transform_1, window_bounds = array<i64: 4, 256>}, {transform_indices = @transform_2, window_bounds = array<i64: 16, 256>}]} {
    %c0 = arith.constant 0 : index
    %c0_0 = arith.constant 0 : index
    %0 = vector.load %arg1[%c0, %c0_0] : memref<8x256xf32, #tpu.memory_space<vmem>>, vector<8x256xf32>
    %1 = vector.extract_strided_slice %0 {offsets = [0, 0], sizes = [4, 256], strides = [1, 1]} : vector<8x256xf32> to vector<4x256xf32>
    %2 = vector.extract_strided_slice %0 {offsets = [4, 0], sizes = [4, 256], strides = [1, 1]} : vector<8x256xf32> to vector<4x256xf32>
    %3 = arith.addf %1, %2 : vector<4x256xf32>
    %cst = arith.constant 5.000000e-01 : f32
    %4 = vector.broadcast %cst : f32 to vector<4x256xf32>
    %5 = arith.mulf %3, %4 : vector<4x256xf32>
    %c0_1 = arith.constant 0 : index
    %c0_2 = arith.constant 0 : index
    %6 = vector.load %arg2[%c0_1, %c0_2] : memref<4x256xf32, #tpu.memory_space<vmem>>, vector<4x256xf32>
    tpu.vector_store %arg2[%c0_1, %c0_2], %5 {strides = array<i32>} : memref<4x256xf32, #tpu.memory_space<vmem>>, vector<4x256xf32>,
    %7 = arith.subf %1, %5 : vector<4x256xf32>
    %8 = arith.subf %2, %5 : vector<4x256xf32>
    %9 = vector.extract_strided_slice %7 {offsets = [0, 0], sizes = [1, 256], strides = [1, 1]} : vector<4x256xf32> to vector<1x256xf32>
    %10 = vector.broadcast %9 : vector<1x256xf32> to vector<4x256xf32>
    %11 = arith.mulf %10, %7 : vector<4x256xf32>
    %12 = vector.extract_strided_slice %8 {offsets = [0, 0], sizes = [1, 256], strides = [1, 1]} : vector<4x256xf32> to vector<1x256xf32>
    %13 = vector.broadcast %12 : vector<1x256xf32> to vector<4x256xf32>
    %14 = arith.mulf %13, %8 : vector<4x256xf32>
    %15 = arith.addf %11, %14 : vector<4x256xf32>
    %cst_3 = arith.constant 1.000000e+00 : f32
    %16 = vector.broadcast %cst_3 : f32 to vector<4x256xf32>
    %17 = arith.mulf %15, %16 : vector<4x256xf32>
    %c0_4 = arith.constant 0 : index
    %c0_5 = arith.constant 0 : index
    %18 = vector.load %arg3[%c0_4, %c0_5] : memref<16x256xf32, #tpu.memory_space<vmem>>, vector<4x256xf32>
    tpu.vector_store %arg3[%c0_4, %c0_5], %17 {strides = array<i32>} : memref<16x256xf32, #tpu.memory_space<vmem>>, vector<4x256xf32>,
    %19 = vector.extract_strided_slice %7 {offsets = [1, 0], sizes = [1, 256], strides = [1, 1]} : vector<4x256xf32> to vector<1x256xf32>
    %20 = vector.broadcast %19 : vector<1x256xf32> to vector<4x256xf32>
    %21 = arith.mulf %20, %7 : vector<4x256xf32>
    %22 = vector.extract_strided_slice %8 {offsets = [1, 0], sizes = [1, 256], strides = [1, 1]} : vector<4x256xf32> to vector<1x256xf32>
    %23 = vector.broadcast %22 : vector<1x256xf32> to vector<4x256xf32>
    %24 = arith.mulf %23, %8 : vector<4x256xf32>
    %25 = arith.addf %21, %24 : vector<4x256xf32>
    %cst_6 = arith.constant 1.000000e+00 : f32
    %26 = vector.broadcast %cst_6 : f32 to vector<4x256xf32>
    %27 = arith.mulf %25, %26 : vector<4x256xf32>
    %c4 = arith.constant 4 : index
    %c0_7 = arith.constant 0 : index
    %28 = vector.load %arg3[%c4, %c0_7] : memref<16x256xf32, #tpu.memory_space<vmem>>, vector<4x256xf32>
    tpu.vector_store %arg3[%c4, %c0_7], %27 {strides = array<i32>} : memref<16x256xf32, #tpu.memory_space<vmem>>, vector<4x256xf32>,
    %29 = vector.extract_strided_slice %7 {offsets = [2, 0], sizes = [1, 256], strides = [1, 1]} : vector<4x256xf32> to vector<1x256xf32>
    %30 = vector.broadcast %29 : vector<1x256xf32> to vector<4x256xf32>
    %31 = arith.mulf %30, %7 : vector<4x256xf32>
    %32 = vector.extract_strided_slice %8 {offsets = [2, 0], sizes = [1, 256], strides = [1, 1]} : vector<4x256xf32> to vector<1x256xf32>
    %33 = vector.broadcast %32 : vector<1x256xf32> to vector<4x256xf32>
    %34 = arith.mulf %33, %8 : vector<4x256xf32>
    %35 = arith.addf %31, %34 : vector<4x256xf32>
    %cst_8 = arith.constant 1.000000e+00 : f32
    %36 = vector.broadcast %cst_8 : f32 to vector<4x256xf32>
    %37 = arith.mulf %35, %36 : vector<4x256xf32>
    %c8 = arith.constant 8 : index
    %c0_9 = arith.constant 0 : index
    %38 = vector.load %arg3[%c8, %c0_9] : memref<16x256xf32, #tpu.memory_space<vmem>>, vector<4x256xf32>
    tpu.vector_store %arg3[%c8, %c0_9], %37 {strides = array<i32>} : memref<16x256xf32, #tpu.memory_space<vmem>>, vector<4x256xf32>,
    %39 = vector.extract_strided_slice %7 {offsets = [3, 0], sizes = [1, 256], strides = [1, 1]} : vector<4x256xf32> to vector<1x256xf32>
    %40 = vector.broadcast %39 : vector<1x256xf32> to vector<4x256xf32>
    %41 = arith.mulf %40, %7 : vector<4x256xf32>
    %42 = vector.extract_strided_slice %8 {offsets = [3, 0], sizes = [1, 256], strides = [1, 1]} : vector<4x256xf32> to vector<1x256xf32>
    %43 = vector.broadcast %42 : vector<1x256xf32> to vector<4x256xf32>
    %44 = arith.mulf %43, %8 : vector<4x256xf32>
    %45 = arith.addf %41, %44 : vector<4x256xf32>
    %cst_10 = arith.constant 1.000000e+00 : f32
    %46 = vector.broadcast %cst_10 : f32 to vector<4x256xf32>
    %47 = arith.mulf %45, %46 : vector<4x256xf32>
    %c12 = arith.constant 12 : index
    %c0_11 = arith.constant 0 : index
    %48 = vector.load %arg3[%c12, %c0_11] : memref<16x256xf32, #tpu.memory_space<vmem>>, vector<4x256xf32>
    tpu.vector_store %arg3[%c12, %c0_11], %47 {strides = array<i32>} : memref<16x256xf32, #tpu.memory_space<vmem>>, vector<4x256xf32>,
    return
  }
  func.func @transform_0(%arg0: i32) -> (i32, i32) {
    %c0_i32 = arith.constant 0 : i32
    %c0_i32_0 = arith.constant 0 : i32
    return %c0_i32, %arg0 : i32, i32
  }
  func.func @transform_1(%arg0: i32) -> (i32, i32) {
    %c0_i32 = arith.constant 0 : i32
    %c0_i32_0 = arith.constant 0 : i32
    return %c0_i32, %arg0 : i32, i32
  }
  func.func @transform_2(%arg0: i32) -> (i32, i32) {
    %c0_i32 = arith.constant 0 : i32
    %c0_i32_0 = arith.constant 0 : i32
    return %c0_i32, %arg0 : i32, i32
  }
}

</mosaic_0001>

<bundles_post_ra>
// kernel: custom-call.6
= control target key start
LH: loop header
LB: loop body
LE: loop exit
PB: predicated region body
PF: predicated region fallthrough
CT: control target
= control target key end

     0   :  { %s367_s6 = smov 0   ;;  %s369_s7 = smov 0   ;;  %s414_s0 = inlined_call_operand.vmem [shape: f32[256,4,4], index: 0, kind: input, shape index: {}]   ;;  %s415_s1 = inlined_call_operand.vmem [shape: f32[256,4,4], index: 1, kind: output, shape index: {}]  }
   0x1   :  { %s371_s8 = smov 0  }
   0x2 LB: > { %s287_s9 = sadd.s32 4294967295, %s354_s8   ;;  %s26_s10 = sadd.s32 1, %s350_s7  ;;  %s354_s8 = sphi %s371_s8, %s7_s8   ;;  %s350_s7 = sphi %s369_s7, %s417_s7   ;;  %s346_s6 = sphi %s367_s6, %s416_s6  }
   0x3   : > { %p28_p0 = scmp.ge.s32.totalorder %s26_s10, 256  ;;  %p289_p1 = scmp.ge.s32.totalorder %s354_s8, 256 }
   0x4   : > { %s42_s11 = sand.u32 (!%p289_p1), 1, %s354_s8   ;;  %s291_s12 = sshll.u32 (!%p289_p1), %s350_s7, 2 }
   0x5   : > { %s419_s10 = smov (%p28_p0, %s26_s10), 0  ;;  %40 = sbr.rel (%p289_p1) target bundleno = 12 (0xc), region = 16 }
   0x6   : > { %s290_s13 = sshll.u32 (!%p289_p1), %s42_s11, 2  ;;  %s48_s16 = scalar_lea.vmem (!%p289_p1), %s414_s0, %s291_s12 }
   0x7   : > { %v64_v0 = vld [vmem:[%s48_s16] sm:$0xf] (!%p289_p1)  ;;  %s44_s17 = scalar_lea.vmem (!%p289_p1), [#allocation1], %s290_s13 }
   0x8   : > { %65 = vst [vmem:[%s44_s17] sm:$0xf] (!%p289_p1), %v64_v0 }
   0xc PF: > { %p292_p2 = scmp.ge.s32.totalorder %s354_s8, 1  ;;  %p81_p3 = scmp.lt.s32.totalorder %s354_s8, 257 }
   0xe   : > { %p82_p4 = pnand %p292_p2, %p81_p3 }
   0xf   : > { %v356_v1 = vmov (!%p82_p4), 0.0   ;;  %s394_s18 = sand.u32 (!%p82_p4), 1, %s287_s9   ;;  %vm104_vm0 = vcmask (!%p82_p4), 7168   ;;  %vm122_vm1 = vcmask (!%p82_p4), 15368   ;;  %vm139_vm2 = vcmask (!%p82_p4), 1047553   ;;  %s296_s22 = sshll.u32 (!%p82_p4), %s346_s6, 2 }
  0x10   : > { %85 = sbr.rel (%p82_p4) target bundleno = 711 (0x2c7), region = 50  ;;  %103 = vst [vmem:[#allocation2] sm:$0xff] (!%p82_p4), %v356_v1  ;;  %s293_s19 = sshll.u32 (!%p82_p4), %s394_s18, 2  ;;  %vm140_vm3 = vmand (!%p82_p4), %vm122_vm1, %vm139_vm2  ;;  %vm144_vm4 = vcmask (!%p82_p4), 23568   ;;  %vm161_vm5 = vcmask (!%p82_p4), 1047554   ;;  %vm166_vm7 = vcmask (!%p82_p4), 31768  }
  0x11   : > { %s94_s20 = scalar_lea.vmem (!%p82_p4), [#allocation1], %s293_s19  ;;  %vm162_vm6 = vmand (!%p82_p4), %vm144_vm4, %vm161_vm5  ;;  %vm183_vm8 = vcmask (!%p82_p4), 1047555   ;;  %s98_s21 = scalar_lea.vmem (!%p82_p4), [#allocation3], %s293_s19 }
  0x12   : > { %v101_v5 = vld [vmem:[%s94_s20] sm:$0xf] (!%p82_p4)  ;;  %vm184_vm9 = vmand (!%p82_p4), %vm166_vm7, %vm183_vm8  ;;  %s201_s25 = scalar_lea.vmem (!%p82_p4), %s415_s1, %s296_s22 }
  0x13   : > { %102 = vst [vmem:[#allocation0] sm:$0xf] (!%p82_p4), %v101_v5 }
  0x17   : > { %v105_v2 = vld [vmem:[#allocation2] ss:$0 sm:$0xff] }
  0x18   : > { %v107_v3 = vmul.f32 %v105_v2, %v105_v2  ;;  %v114_v4 = vmul.f32 0.0, %v105_v2 }
  0x1a   : > { %108 = vadd.xlane.f32.xlu0 %v107_v3  ;;  %v106_v6 = vld [vmem:[#allocation0] ss:$0 sm:$0xff]  ;;  %v126_v18 = vld [vmem:[#allocation0 + $0x1] ss:$0 sm:$0xff]  ;;  %v148_v30 = vld [vmem:[#allocation0 + $0x2] ss:$0 sm:$0xff] }
  0x1b   : > { %v112_v10 = vld [vmem:[#allocation0] sm:$0xff] }
  0x1c   : > { %v170_v42 = vld [vmem:[#allocation0 + $0x3] ss:$0 sm:$0xff] }
  0x1e   : > { %115 = vadd.xlane.f32.xlu0 %v114_v4 }
  0xa7   : > { %v109_v7 = vpop.xlane.xlu0 %108 }
  0xa8   : > { %v110_v8 = vsub.f32 %v106_v6, %v109_v7 }
  0xaa   : > { %324 = vrsqrt.f32 %v110_v8 }
  0xab   : > { %v116_v9 = vpop.xlane.xlu0 %115 }
  0xac   : > { %v117_v11 = vsub.f32 %v112_v10, %v116_v9 }
  0xb4   : > { %v325_v12 = vpop.eup %324 }
  0xb5   : > { %v118_v13 = vmul.f32 %v325_v12, %v117_v11 }
  0xb7   : > { %v119_v14 = vsel %vm104_vm0, %v118_v13, 0.0 }
  0xb8   : > { %121 = vst [vmem:[#allocation2] sm:$0xff] %v119_v14 }
  0xbf   : > { %v124_v15 = vld [vmem:[#allocation2 + $0x1] ss:$0 sm:$0xff] }
  0xc0   : > { %v127_v16 = vmul.f32 %v124_v15, %v124_v15  ;;  %v134_v17 = vmul.f32 %v124_v15, %v119_v14 }
  0xc2   : > { %128 = vadd.xlane.f32.xlu1 %v127_v16 }
  0xc6   : > { %135 = vadd.xlane.f32.xlu1 %v134_v17 }
 0x14f   : > { %v129_v19 = vpop.xlane.xlu1 %128 }
 0x150   : > { %v130_v20 = vsub.f32 %v126_v18, %v129_v19 }
 0x152   : > { %326 = vrsqrt.f32 %v130_v20 }
 0x153   : > { %v136_v21 = vpop.xlane.xlu1 %135 }
 0x154   : > { %v137_v22 = vsub.f32 %v112_v10, %v136_v21 }
 0x15c   : > { %v327_v23 = vpop.eup %326 }
 0x15d   : > { %v138_v24 = vmul.f32 %v327_v23, %v137_v22 }
 0x15f   : > { %v141_v25 = vsel %vm140_vm3, %v138_v24, 0.0 }
 0x160   : > { %v142_v26 = vadd.f32 %v141_v25, %v119_v14 }
 0x162   : > { %143 = vst [vmem:[#allocation2] sm:$0xff] %v142_v26 }
 0x169   : > { %v146_v27 = vld [vmem:[#allocation2 + $0x2] ss:$0 sm:$0xff] }
 0x16a   : > { %v156_v28 = vmul.f32 %v146_v27, %v142_v26  ;;  %v149_v29 = vmul.f32 %v146_v27, %v146_v27 }
 0x16c   : > { %157 = vadd.xlane.f32.xlu1 %v156_v28  ;;  %150 = vadd.xlane.f32.xlu0 %v149_v29 }
 0x1f9   : > { %v151_v31 = vpop.xlane.xlu0 %150  ;;  %v158_v33 = vpop.xlane.xlu1 %157 }
 0x1fa   : > { %v152_v32 = vsub.f32 %v148_v30, %v151_v31  ;;  %v159_v34 = vsub.f32 %v112_v10, %v158_v33 }
 0x1fc   : > { %328 = vrsqrt.f32 %v152_v32 }
 0x206   : > { %v329_v35 = vpop.eup %328 }
 0x207   : > { %v160_v36 = vmul.f32 %v329_v35, %v159_v34 }
 0x209   : > { %v163_v37 = vsel %vm162_vm6, %v160_v36, 0.0 }
 0x20a   : > { %v164_v38 = vadd.f32 %v163_v37, %v142_v26 }
 0x20c   : > { %165 = vst [vmem:[#allocation2] sm:$0xff] %v164_v38 }
 0x213   : > { %v168_v39 = vld [vmem:[#allocation2 + $0x3] ss:$0 sm:$0xff] }
 0x214   : > { %v178_v40 = vmul.f32 %v168_v39, %v164_v38  ;;  %v171_v41 = vmul.f32 %v168_v39, %v168_v39 }
 0x216   : > { %179 = vadd.xlane.f32.xlu1 %v178_v40  ;;  %172 = vadd.xlane.f32.xlu0 %v171_v41 }
 0x2a3   : > { %v173_v43 = vpop.xlane.xlu0 %172  ;;  %v180_v45 = vpop.xlane.xlu1 %179 }
 0x2a4   : > { %v174_v44 = vsub.f32 %v170_v42, %v173_v43  ;;  %v181_v46 = vsub.f32 %v112_v10, %v180_v45 }
 0x2a6   : > { %330 = vrsqrt.f32 %v174_v44 }
 0x2b0   : > { %v331_v47 = vpop.eup %330 }
 0x2b1   : > { %v182_v48 = vmul.f32 %v331_v47, %v181_v46 }
 0x2b3   : > { %v185_v49 = vsel %vm184_vm9, %v182_v48, 0.0 }
 0x2b4   : > { %v186_v50 = vadd.f32 %v185_v49, %v164_v38 }
 0x2b6   : > { %187 = vst [vmem:[#allocation2] sm:$0xff] %v186_v50 }
 0x2bd   : > { %v191_v51 = vld [vmem:[#allocation2] sm:$0xf] }
 0x2be   : > { %193 = vst [vmem:[%s98_s21] sm:$0xf] %v191_v51 }
 0x2c5   : > { %v217_v52 = vld [vmem:[%s98_s21] sm:$0xf] }
 0x2c6   : > { %218 = vst [vmem:[%s201_s25] sm:$0xf] %v217_v52 }
 0x2c7 PF: > { %s7_s8 = sadd.s32 1, %s354_s8   ;;  %s416_s6 = smov %s350_s7 }
 0x2c8   : > { %p4_p5 = scmp.ge.s32.totalorder %s7_s8, 258   ;;  %s417_s7 = smov %s419_s10 }
 0x2ca   :  { %6 = sbr.rel (!%p4_p5) target bundleno = 2 (0x2), region = 116 }

// kernel: multivariate_gaussian_fit.1
= control target key start
LH: loop header
LB: loop body
LE: loop exit
PB: predicated region body
PF: predicated region fallthrough
CT: control target
= control target key end

     0   :  { %v36_v2 = vlaneseq  ;;  %s289_s0 = inlined_call_operand.vmem [shape: f32[8,256], index: 0, kind: input, shape index: {}]   ;;  %s290_s1 = inlined_call_operand.hbm [shape: f32[4,256], index: 1, kind: output, shape index: {0}]   ;;  %s291_s2 = inlined_call_operand.vmem [shape: f32[16,256], index: 2, kind: output, shape index: {1}]  }
   0x1   :  { %v11_v0 = vld [vmem:[%s289_s0] sm:$0xff]  ;;  %v12_v1 = vld [vmem:[%s289_s0 + $0x8] sm:$0xff] }
   0x2   :  { %8 = vsyncpa [#allocation3], 0  ;;  %v15_v3 = vrot.slane %v11_v0, 4  ;;  %v16_v4 = vrot.slane %v12_v1, 4  ;;  %v233_v5 = vshrl.u32 %v36_v2, 7  ;;  %s211_s13 = smov [#allocation2]  }
   0x3   :  { %s174_s14 = sshll.u32 %s211_s13, 4  ;;  %s175_s14 = int_to_ptr.vmem [resolvable:$true] %s174_s14 }
   0x4   :  { %v19_v6 = vadd.f32 %v15_v3, %v11_v0  ;;  %v20_v7 = vadd.f32 %v16_v4, %v12_v1  ;;  %v38_v10 = vsub.s32 0, %v233_v5  ;;  %v68_v11 = vsub.s32 1, %v233_v5  ;;  %s187_s0 = scalar_lea.vmem %s175_s14, 128  ;;  %p192_p1 = scmp.lt.s32.totalorder %s175_s14, %s175_s14 }
   0x5   :  { %v48_v12 = vsub.s32 4, %v233_v5  ;;  %v78_v13 = vsub.s32 5, %v233_v5  ;;  %v104_v14 = vsub.s32 2, %v233_v5  ;;  %v114_v20 = vsub.s32 6, %v233_v5  ;;  %p188_p0 = scmp.ne.s32.totalorder %s175_s14, %s187_s0  ;;  %p193_p2 = scmp.lt.s32.totalorder %s187_s0, %s187_s0 }
   0x6   :  { %v21_v8 = vmul.f32 0.5, %v19_v6  ;;  %v22_v9 = vmul.f32 0.5, %v20_v7  ;;  %v134_v21 = vsub.s32 3, %v233_v5  ;;  %v144_v22 = vsub.s32 7, %v233_v5 }
   0x7   :  { %p194_p3 = por %p193_p2, %p192_p1 }
   0x8   :  { %v25_v15 = vcombine.low %v21_v8, %v22_v9  ;;  %v28_v16 = vsub.f32 %v11_v0, %v21_v8  ;;  %v240_v17 = vsub.f32 %v12_v1, %v22_v9  ;;  %v30_v18 = vrot.slane %v21_v8, 4 }
   0x9   :  { %v31_v19 = vrot.slane %v22_v9, 4  ;;  %p195_p4 = pnand %p194_p3, %p188_p0 }
   0xa   :  { %27 = vst [vmem:[#allocation2] sm:$0xff] %v25_v15  ;;  %v34_v23 = vsub.f32 %v11_v0, %v30_v18  ;;  %v39_v24 = vrot.slane %v28_v16, %v38_v10  ;;  %v43_v25 = vrot.slane %v240_v17, %v38_v10  ;;  %v69_v26 = vrot.slane %v28_v16, %v68_v11 }
   0xb   :  { %v35_v27 = vsub.f32 %v12_v1, %v31_v19  ;;  %v73_v28 = vrot.slane %v240_v17, %v68_v11  ;;  %v105_v29 = vrot.slane %v28_v16, %v104_v14  ;;  %v109_v30 = vrot.slane %v240_v17, %v104_v14 }
   0xc   :  { %198 = shalt.err (!%p195_p4)
}
   0xd   :  { %s199_s17 = scalar_lea.hbm %s290_s1, 128 }
   0xe   :  { %p200_p5 = scmp.ne.s32.totalorder %s290_s1, %s199_s17  ;;  %p203_p6 = scmp.lt.u32.totalorder %s199_s17, %s290_s1 }
  0x10   :  { %p205_p7 = pnand %p203_p6, %p200_p5 }
  0x12   :  { %208 = shalt.err (!%p205_p7)
}
  0x13   :  { %177 = dma.vmem_to_hbm [thread:$0]  %s175_s14, 128, %s290_s1, [#allocation3]   ;;  %v44_v31 = vmul.f32 %v39_v24, %v28_v16  ;;  %v49_v32 = vrot.slane %v34_v23, %v48_v12  ;;  %v45_v33 = vmul.f32 %v43_v25, %v240_v17  ;;  %v74_v34 = vmul.f32 %v69_v26, %v28_v16 }
  0x14   :  { %v53_v35 = vrot.slane %v35_v27, %v48_v12  ;;  %v79_v36 = vrot.slane %v34_v23, %v78_v13  ;;  %v75_v37 = vmul.f32 %v73_v28, %v240_v17  ;;  %v83_v38 = vrot.slane %v35_v27, %v78_v13 }
  0x15   :  { %v54_v39 = vmul.f32 %v49_v32, %v34_v23  ;;  %v110_v40 = vmul.f32 %v105_v29, %v28_v16  ;;  %v115_v41 = vrot.slane %v34_v23, %v114_v20  ;;  %v111_v42 = vmul.f32 %v109_v30, %v240_v17 }
  0x16   :  { %v55_v43 = vmul.f32 %v53_v35, %v35_v27  ;;  %v84_v44 = vmul.f32 %v79_v36, %v34_v23  ;;  %v85_v45 = vmul.f32 %v83_v38, %v35_v27  ;;  %v119_v46 = vrot.slane %v35_v27, %v114_v20 }
  0x17   :  { %v58_v47 = vrot.slane %v54_v39, 4  ;;  %v120_v48 = vmul.f32 %v115_v41, %v34_v23  ;;  %v135_v49 = vrot.slane %v28_v16, %v134_v21  ;;  %v145_v50 = vrot.slane %v34_v23, %v144_v22 }
  0x18   :  { %v59_v51 = vrot.slane %v55_v43, 4  ;;  %v88_v52 = vrot.slane %v84_v44, 4  ;;  %v89_v53 = vrot.slane %v85_v45, 4  ;;  %v121_v54 = vmul.f32 %v119_v46, %v35_v27 }
  0x19   :  { %v62_v55 = vadd.f32 %v58_v47, %v44_v31  ;;  %v124_v56 = vrot.slane %v120_v48, 4  ;;  %v140_v57 = vmul.f32 %v135_v49, %v28_v16  ;;  %v150_v58 = vmul.f32 %v145_v50, %v34_v23 }
  0x1a   :  { %v63_v59 = vadd.f32 %v59_v51, %v45_v33  ;;  %v92_v60 = vadd.f32 %v88_v52, %v74_v34  ;;  %v93_v61 = vadd.f32 %v89_v53, %v75_v37  ;;  %v125_v62 = vrot.slane %v121_v54, 4 }
  0x1b   :  { %64 = vst [vmem:[%s291_s2] sm:$0xf] %v62_v55  ;;  %v128_v63 = vadd.f32 %v124_v56, %v110_v40  ;;  %v154_v0 = vrot.slane %v150_v58, 4  ;;  %v139_v1 = vrot.slane %v240_v17, %v134_v21  ;;  %v149_v2 = vrot.slane %v35_v27, %v144_v22 }
  0x1c   :  { %65 = vst [vmem:[%s291_s2 + $0x8] sm:$0xf] %v63_v59  ;;  %v96_v3 = vrot.slane %v92_v60, 4  ;;  %v97_v4 = vrot.slane %v93_v61, 4  ;;  %v129_v5 = vadd.f32 %v125_v62, %v111_v42 }
  0x1d   :  { %130 = vst [vmem:[%s291_s2 + $0x10] sm:$0xf] %v128_v63  ;;  %v158_v6 = vadd.f32 %v154_v0, %v140_v57  ;;  %v141_v7 = vmul.f32 %v139_v1, %v240_v17  ;;  %v151_v8 = vmul.f32 %v149_v2, %v35_v27 }
  0x1e   :  { %100 = vst [vmem:[%s291_s2] sm:$0xf0] %v96_v3  ;;  %101 = vst [vmem:[%s291_s2 + $0x8] sm:$0xf0] %v97_v4 }
  0x1f   :  { %131 = vst [vmem:[%s291_s2 + $0x18] sm:$0xf] %v129_v5  ;;  %v162_v9 = vrot.slane %v158_v6, 4  ;;  %v155_v10 = vrot.slane %v151_v8, 4 }
  0x21   :  { %166 = vst [vmem:[%s291_s2 + $0x10] sm:$0xf0] %v162_v9  ;;  %v159_v11 = vadd.f32 %v155_v10, %v141_v7 }
  0x23   :  { %v163_v12 = vrot.slane %v159_v11, 4 }
  0x25   :  { %167 = vst [vmem:[%s291_s2 + $0x18] sm:$0xf0] %v163_v12 }
  0x26   :  { %209 = dma.done.wait [#allocation3], 128  }
  0x27   :  { %210 = vsyncadd [#allocation3], 4294967168 }
  0x28   :  { %185 = vsyncpa [#allocation3], 1 }

// kernel: custom-call.7
= control target key start
LH: loop header
LB: loop body
LE: loop exit
PB: predicated region body
PF: predicated region fallthrough
CT: control target
= control target key end

     0   :  { %s634_s6 = smov 0   ;;  %s636_s7 = smov 0   ;;  %s694_s0 = inlined_call_operand.vmem [shape: f32[256,1,4,4], index: 0, kind: input, shape index: {}]   ;;  %s695_s1 = inlined_call_operand.vmem [shape: f32[256,1,4,4], index: 1, kind: output, shape index: {}]  }
   0x1   :  { %s638_s8 = smov 0  }
   0x2 LB: > { %s475_s9 = sadd.s32 4294967295, %s604_s8   ;;  %s22_s10 = sadd.s32 1, %s600_s7  ;;  %s604_s8 = sphi %s638_s8, %s7_s8   ;;  %s600_s7 = sphi %s636_s7, %s697_s7   ;;  %s596_s6 = sphi %s634_s6, %s696_s6  }
   0x3   : > { %p23_p0 = scmp.ge.s32.totalorder %s22_s10, 2  ;;  %p477_p1 = scmp.ge.s32.totalorder %s604_s8, 2 }
   0x4   : > { %s49_s11 = sand.u32 (!%p477_p1), 1, %s604_s8   ;;  %s479_s12 = sshll.u32 (!%p477_p1), %s600_s7, 2 }
   0x5   : > { %s699_s10 = smov (%p23_p0, %s22_s10), 0  ;;  %47 = sbr.rel (%p477_p1) target bundleno = 12 (0xc), region = 16 }
   0x6   : > { %s478_s13 = sshll.u32 (!%p477_p1), %s49_s11, 4  ;;  %s59_s16 = scalar_lea.vmem (!%p477_p1), %s694_s0, %s479_s12 }
   0x7   : > { %v75_v0 = vld [vmem:[%s59_s16] sm:$0xf] (!%p477_p1)  ;;  %v77_v1 = vld [vmem:[%s59_s16 + $0x8] sm:$0xf] (!%p477_p1)  ;;  %s51_s17 = scalar_lea.vmem (!%p477_p1), [#allocation1], %s478_s13 }
   0x8   : > { %76 = vst [vmem:[%s51_s17] sm:$0xf] (!%p477_p1), %v75_v0  ;;  %78 = vst [vmem:[%s51_s17 + $0x4] sm:$0xf] (!%p477_p1), %v77_v1  ;;  %v79_v2 = vld [vmem:[%s59_s16 + $0x10] sm:$0xf] (!%p477_p1) }
   0x9   : > { %v81_v3 = vld [vmem:[%s59_s16 + $0x18] sm:$0xf] (!%p477_p1)  ;;  %80 = vst [vmem:[%s51_s17 + $0x8] sm:$0xf] (!%p477_p1), %v79_v2 }
   0xa   : > { %82 = vst [vmem:[%s51_s17 + $0xc] sm:$0xf] (!%p477_p1), %v81_v3 }
   0xc PF: > { %p480_p2 = scmp.ge.s32.totalorder %s604_s8, 1  ;;  %p112_p3 = scmp.lt.s32.totalorder %s604_s8, 3 }
   0xe   : > { %p113_p4 = pnand %p480_p2, %p112_p3 }
  0x10   : > { %116 = sbr.rel (%p113_p4) target bundleno = 181 (0xb5), region = 57 }
  0x17   : > { %s123_s18 = sand.u32 1, %s475_s9   ;;  %s606_s22 = smov 0  }
  0x18   : > { %s481_s19 = sshll.u32 %s123_s18, 4 }
  0x19   : > { %s125_s20 = scalar_lea.vmem [#allocation1], %s481_s19  ;;  %s661_s21 = scalar_lea.vmem [#allocation3], %s481_s19 }
  0x1a   : > { %v483_v4 = vld [vmem:[%s125_s20 + $0xc] sm:$0xf]  ;;  %v484_v5 = vld [vmem:[%s125_s20 + $0x8] sm:$0xf]  ;;  %v485_v6 = vld [vmem:[%s125_s20 + $0x4] sm:$0xf] }
  0x1b   : > { %136 = vst [vmem:[#allocation0 + $0x18] sm:$0xf] %v483_v4  ;;  %141 = vst [vmem:[#allocation0 + $0x10] sm:$0xf] %v484_v5  ;;  %v146_v7 = vld [vmem:[%s125_s20] sm:$0xf] }
  0x1c   : > { %145 = vst [vmem:[#allocation0 + $0x8] sm:$0xf] %v485_v6  ;;  %147 = vst [vmem:[#allocation0] sm:$0xf] %v146_v7 }
  0x1d LB: >> { %v164_v8 = vlaneseq  ;;  %s486_s23 = sshll.u32 %s608_s22, 3  ;;  %v167_v11 = vstv %s608_s22  ;;  %s158_s26 = scalar_lea.vmem [#allocation5], %s608_s22  ;;  %s608_s22 = sphi %s606_s22, %s153_s22  }
  0x1e   : >> { %s155_s24 = sadd.s32 %s608_s22, %s486_s23  ;;  %s161_s27 = scalar_lea.vmem [#allocation0], %s486_s23 }
  0x1f   : >> { %v165_v9 = vshrl.u32 %v164_v8, 7  ;;  %s156_s25 = scalar_lea.vmem [#allocation0], %s155_s24  ;;  %s162_s28 = scalar_lea.vmem [#allocation4], %s486_s23 }
  0x20   : >> { %s153_s22 = sadd.s32 1, %s608_s22  }
  0x21   : >> { %vm168_vm0 = vcmp.ge.s32.totalorder %v167_v11, %v165_v9  ;;  %vm169_vm1 = vcmp.lt.s32.totalorder %v165_v9, 4  ;;  %p150_p5 = scmp.ge.s32.totalorder %s153_s22, 4  }
  0x22   : >> { %vm170_vm2 = vmand %vm168_vm0, %vm169_vm1  ;;  %s610_s29 = smov (%p150_p5), 0  }
  0x23   : >> { %v157_v10 = vld [vmem:[%s156_s25] ss:$0 sm:$0xff] }
  0x24   : >> { %159 = vst [vmem:[%s158_s26] sm:$0x1] %v157_v10  ;;  %562 = vrcp.f32 %v157_v10  ;;  %v163_v12 = vld [vmem:[%s161_s27] sm:$0xff] }
  0x25   : >> { %v171_v13 = vsel %vm170_vm2, %v163_v12, 0.0 }
  0x2d   : > { %152 = sbr.rel (!%p150_p5) target bundleno = 29 (0x1d), region = 182 }
  0x2e   : >> { %v563_v14 = vpop.eup %562 }
  0x2f   : >> { %v173_v15 = vmul.f32 %v563_v14, %v171_v13 }
  0x31   : >> { %v174_v16 = vxor.u32 2147483648, %v173_v15 }
  0x33   : >> { %175 = vst [vmem:[%s162_s28] sm:$0xff] %v174_v16 }
  0x34 LB: >> { %v182_v17 = vstv %s612_s29  ;;  %s488_s30 = sshll.u32 %s612_s29, 3  ;;  %v622_v18 = vmov 0.0   ;;  %s181_s29 = sadd.s32 1, %s612_s29   ;;  %s612_s29 = sphi %s610_s29, %s181_s29  }
  0x35   : >> { %vm186_vm3 = vcmp.eq.s32.totalorder %v182_v17, %v165_v9  ;;  %s188_s2 = scalar_lea.vmem [#allocation2], %s488_s30  ;;  %p178_p6 = scmp.ge.s32.totalorder %s181_s29, 4  }
  0x36   : >> { %v189_v19 = vsel %vm186_vm3, -1.0, %v622_v18  ;;  %v623_v20 = vmov (%p178_p6), 1.0   ;;  %s663_s3 = smov (%p178_p6), 1  }
  0x37   : >> { %190 = vst [vmem:[%s188_s2] sm:$0xff] %v189_v19  ;;  %180 = sbr.rel (!%p178_p6) target bundleno = 52 (0x34), region = 193 }
  0x38   : > { %191 = vst [vmem:[#allocation2] sm:$0x1] (%p178_p6), %v623_v20 }
  0x3e LB: >> { %s489_s4 = sshll.u32 %s616_s3, 3  ;;  %s203_s9 = scalar_lea.vmem [#allocation2], %s616_s3  ;;  %s616_s3 = sphi %s663_s3, %s197_s3  }
  0x3f   : >> { %v201_v21 = vld [vmem:[#allocation2] sm:$0xff]  ;;  %s199_s5 = scalar_lea.vmem [#allocation4], %s489_s4  ;;  %s197_s3 = sadd.s32 1, %s616_s3  }
  0x40   : >> { %v200_v22 = vld [vmem:[%s199_s5] sm:$0xff]  ;;  %p194_p7 = scmp.ge.s32.totalorder %s197_s3, 4  }
  0x41   : >> { %v202_v23 = vmul.f32 %v201_v21, %v200_v22  ;;  %s618_s11 = smov (%p194_p7), 0  }
  0x43   : >> { %v204_v24 = vrot.slane %v202_v23, 4 }
  0x45   : >> { %v205_v25 = vadd.f32 %v204_v24, %v202_v23 }
  0x47   : >> { %v206_v26 = vrot.slane %v205_v25, 2 }
  0x49   : >> { %v207_v27 = vadd.f32 %v206_v26, %v205_v25 }
  0x4b   : >> { %v208_v28 = vrot.slane %v207_v27, 1 }
  0x4d   : >> { %v209_v29 = vadd.f32 %v208_v28, %v207_v27 }
  0x4f   : >> { %210 = vst [vmem:[%s203_s9] sm:$0x1] %v209_v29 }
  0x56   : >> { %v215_v30 = vld [vmem:[#allocation2 + $0x8] sm:$0xff] }
  0x57   : >> { %v216_v31 = vmul.f32 %v215_v30, %v200_v22 }
  0x59   : >> { %v219_v32 = vrot.slane %v216_v31, 4 }
  0x5b   : >> { %v220_v33 = vadd.f32 %v219_v32, %v216_v31 }
  0x5d   : >> { %v221_v34 = vrot.slane %v220_v33, 2 }
  0x5f   : >> { %v222_v35 = vadd.f32 %v221_v34, %v220_v33 }
  0x61   : >> { %v223_v36 = vrot.slane %v222_v35, 1 }
  0x63   : >> { %v224_v37 = vadd.f32 %v223_v36, %v222_v35 }
  0x65   : >> { %491 = vst [vmem:[%s203_s9 + $0x8] sm:$0x1] %v224_v37 }
  0x6c   : >> { %v230_v38 = vld [vmem:[#allocation2 + $0x10] sm:$0xff] }
  0x6d   : >> { %v231_v39 = vmul.f32 %v230_v38, %v200_v22 }
  0x6f   : >> { %v234_v40 = vrot.slane %v231_v39, 4 }
  0x71   : >> { %v235_v41 = vadd.f32 %v234_v40, %v231_v39 }
  0x73   : >> { %v236_v42 = vrot.slane %v235_v41, 2 }
  0x75   : >> { %v237_v43 = vadd.f32 %v236_v42, %v235_v41 }
  0x77   : >> { %v238_v44 = vrot.slane %v237_v43, 1 }
  0x79   : >> { %v239_v45 = vadd.f32 %v238_v44, %v237_v43 }
  0x7b   : >> { %493 = vst [vmem:[%s203_s9 + $0x10] sm:$0x1] %v239_v45 }
  0x82   : >> { %v245_v46 = vld [vmem:[#allocation2 + $0x18] sm:$0xff] }
  0x83   : >> { %v246_v47 = vmul.f32 %v245_v46, %v200_v22 }
  0x85   : >> { %v249_v48 = vrot.slane %v246_v47, 4 }
  0x87   : >> { %v250_v49 = vadd.f32 %v249_v48, %v246_v47 }
  0x89   : >> { %v251_v50 = vrot.slane %v250_v49, 2 }
  0x8b   : >> { %v252_v51 = vadd.f32 %v251_v50, %v250_v49  ;;  %196 = sbr.rel (!%p194_p7) target bundleno = 62 (0x3e), region = 204 }
  0x8d   : >> { %v253_v52 = vrot.slane %v252_v51, 1 }
  0x8f   : >> { %v254_v53 = vadd.f32 %v253_v52, %v252_v51 }
  0x91   : >> { %495 = vst [vmem:[%s203_s9 + $0x18] sm:$0x1] %v254_v53 }
  0x92 LB: >> { %s262_s12 = scalar_lea.vmem [#allocation5], %s620_s11  ;;  %s496_s13 = sshll.u32 %s620_s11, 3  ;;  %s620_s11 = sphi %s618_s11, %s261_s11  }
  0x93   : >> { %v263_v54 = vld [vmem:[%s262_s12] ss:$0 sm:$0xff]  ;;  %s265_s14 = scalar_lea.vmem [#allocation2], %s496_s13  ;;  %s261_s11 = sadd.s32 1, %s620_s11  }
  0x94   : >> { %564 = vrcp.f32 %v263_v54  ;;  %vm269_vm4 = vweird.f32 %v263_v54  ;;  %p258_p8 = scmp.ge.s32.totalorder %s261_s11, 4  }
  0x95   : > { %s501_s15 = sshll.u32 (%p258_p8), %s596_s6, 2 }
  0x96   : > { %s306_s18 = scalar_lea.vmem (%p258_p8), %s695_s1, %s501_s15 }
  0x98   : >> { %v266_v55 = vld [vmem:[%s265_s14] sm:$0xff] }
  0x9c   : > { %260 = sbr.rel (!%p258_p8) target bundleno = 146 (0x92), region = 215 }
  0x9e   : >> { %v565_v56 = vpop.eup %564 }
  0x9f   : >> { %v268_v57 = vmul.f32 %v565_v56, %v266_v55 }
  0xa1   : >> { %v270_v58 = vsel %vm269_vm4, %v266_v55, %v268_v57 }
  0xa2   : >> { %271 = vst [vmem:[%s265_s14] sm:$0xff] %v270_v58 }
  0xa9   : > { %v275_v59 = vld [vmem:[#allocation2] sm:$0xf]  ;;  %v279_v60 = vld [vmem:[#allocation2 + $0x8] sm:$0xf]  ;;  %v284_v61 = vld [vmem:[#allocation2 + $0x10] sm:$0xf] }
  0xaa   : > { %277 = vst [vmem:[%s661_s21] sm:$0xf] %v275_v59  ;;  %497 = vst [vmem:[%s661_s21 + $0x4] sm:$0xf] %v279_v60  ;;  %v290_v62 = vld [vmem:[#allocation2 + $0x18] sm:$0xf] }
  0xab   : > { %498 = vst [vmem:[%s661_s21 + $0x8] sm:$0xf] %v284_v61  ;;  %499 = vst [vmem:[%s661_s21 + $0xc] sm:$0xf] %v290_v62 }
  0xb1   : > { %v322_v63 = vld [vmem:[%s661_s21] sm:$0xf]  ;;  %v324_v0 = vld [vmem:[%s661_s21 + $0x4] sm:$0xf] }
  0xb2   : > { %v326_v1 = vld [vmem:[%s661_s21 + $0x8] sm:$0xf]  ;;  %323 = vst [vmem:[%s306_s18] sm:$0xf] %v322_v63  ;;  %325 = vst [vmem:[%s306_s18 + $0x8] sm:$0xf] %v324_v0 }
  0xb3   : > { %327 = vst [vmem:[%s306_s18 + $0x10] sm:$0xf] %v326_v1  ;;  %v328_v2 = vld [vmem:[%s661_s21 + $0xc] sm:$0xf] }
  0xb4   : > { %329 = vst [vmem:[%s306_s18 + $0x18] sm:$0xf] %v328_v2 }
  0xb5 PF: > { %s7_s8 = sadd.s32 1, %s604_s8   ;;  %s696_s6 = smov %s600_s7 }
  0xb6   : > { %p4_p9 = scmp.ge.s32.totalorder %s7_s8, 4   ;;  %s697_s7 = smov %s699_s10 }
  0xb8   :  { %6 = sbr.rel (!%p4_p9) target bundleno = 2 (0x2), region = 226 }

</bundles_post_ra>
